<compile_context>
chip_gen: v5e
topology: v5e:2x2
jax: 0.10.0
libtpu: 0.0.40
codegen_flags: <defaults>
</compile_context>

<pallas_src>
import numpy as np
import jax
import jax.numpy as jnp
from jax.experimental import pallas as pl
from jax.experimental.pallas import tpu as pltpu


# --------------------------------------------------------------------------- #
# Helpers
# --------------------------------------------------------------------------- #
def _adaptive_pool_matrix(in_size: int, out_size: int) -> np.ndarray:
    """P[i, p] = weight of input pixel p in adaptive-avg-pool output cell i.
    Matches torch.nn.AdaptiveAvgPool2d: start = floor(i*in/out),
    end = ceil((i+1)*in/out)."""
    P = np.zeros((out_size, in_size), dtype=np.float32)
    for i in range(out_size):
        s = (i * in_size) // out_size
        e = -(-((i + 1) * in_size) // out_size)
        P[i, s:e] = 1.0 / (e - s)
    return P


def _vmem_capacity_bytes(default: int = 64 << 20) -> int:
    """Physical VMEM of the current TPU generation (conservative fallback)."""
    try:
        cap = int(pltpu.get_tpu_info().vmem_capacity_bytes)
        if cap >= (16 << 20):
            return cap
    except Exception:
        pass
    return default


def _divisors(n: int):
    return [d for d in range(1, n + 1) if n % d == 0]


def _choose_scale_tiling(N, C_out, Hh, Wh, itemsize, target_bytes):
    """Pick block sizes for the gate * x_high pass.

    Returns either
      {"mode": "flat", "nb", "t"}   -- Hh*Wh flattened on lanes, tile of t lanes
      {"mode": "4d",  "nb", "cb", "th"} -- 4-D blocks (nb, cb, th, Wh)

    Preference order per candidate: fits in target VMEM block budget, has >= 2
    grid steps (both v7x TCs busy), has >= 4 steps, then largest block (to
    amortize the ~0.35us/step pipeline overhead).
    """
    HW = Hh * Wh

    def score(blk, steps):
        fits = blk <= target_bytes
        return (fits, steps >= 2, min(steps, 4), blk if fits else -blk)

    if HW % 128 == 0:
        lane_ts = [t for t in range(128, HW + 1, 128) if HW % t == 0]
        best = None
        for nb in _divisors(N):
            for t in lane_ts:
                blk = nb * C_out * t * itemsize
                steps = (N // nb) * (HW // t)
                s = score(blk, steps)
                if best is None or s > best[0]:
                    best = (s, (nb, t))
        nb, t = best[1]
        return {"mode": "flat", "nb": nb, "t": t}

    # Fallback: keep x_high 4-D (Wh on lanes, partially masked stores) and tile
    # rows of Hh and, if necessary, channels -- never a monolithic HW block.
    th_cands = sorted(set([th for th in _divisors(Hh) if th % 8 == 0] + [Hh]))
    best = None
    for nb in _divisors(N):
        for cb in _divisors(C_out):
            for th in th_cands:
                blk = nb * cb * th * Wh * itemsize
                steps = (N // nb) * (C_out // cb) * (Hh // th)
                s = score(blk, steps)
                if best is None or s > best[0]:
                    best = (s, (nb, cb, th))
    nb, cb, th = best[1]
    return {"mode": "4d", "nb": nb, "cb": cb, "th": th}


# --------------------------------------------------------------------------- #
# Kernel 1: batched gate computation (tiny, runs once).
#   pooled_ref: (N, C_in*16)    adaptive-pooled + flattened x_low (f32)
#   w1_ref    : (C_in*16, C_out) 4x4-conv weights flattened + transposed
#   w2_ref    : (C_out, C_out)   1x1-conv weights, transposed
#   gate_ref  : (N, C_out)       sigmoid gate, in the activation dtype
# --------------------------------------------------------------------------- #
def sle_gate_kernel(pooled_ref, w1_ref, w2_ref, gate_ref):
    h1 = jnp.dot(pooled_ref[...], w1_ref[...],
                 preferred_element_type=jnp.float32)         # Conv2d 4x4 (valid)
    h1 = h1 * jax.nn.sigmoid(h1)                             # Swish
    h2 = jnp.dot(h1, w2_ref[...],
                 preferred_element_type=jnp.float32)         # Conv2d 1x1
    gate_ref[...] = jax.nn.sigmoid(h2).astype(gate_ref.dtype)


# --------------------------------------------------------------------------- #
# Kernel 2: memory-bound broadcast multiply (same body for 3-D and 4-D blocks).
#   gate_ref: (nb, cb, 1[, 1])      per-(batch, channel) gate
#   x_ref   : (nb, cb, T) or (nb, cb, th, Wh)
# --------------------------------------------------------------------------- #
def sle_scale_kernel(gate_ref, x_ref, o_ref):
    o_ref[...] = x_ref[...] * gate_ref[...]


# --------------------------------------------------------------------------- #
# Wrapper
# --------------------------------------------------------------------------- #
def sle_block_forward(x_low, x_high, w1, w2):
    """x_low: (N, C_in, H, W), x_high: (N, C_out, Hh, Wh)  (both NCHW).
       w1: (C_out, C_in, 4, 4), w2: (C_out, C_out, 1, 1)   (PyTorch conv weights).
    Returns (N, C_out, Hh, Wh)."""
    N, C_in, H, W = x_low.shape
    Nh, C_out, Hh, Wh = x_high.shape
    assert N == Nh
    HW = Hh * Wh
    itemsize = jnp.dtype(x_high.dtype).itemsize

    vmem_cap = _vmem_capacity_bytes()
    target_block_bytes = max(vmem_cap // 8, 1 << 20)   # ~8 MiB v7x, ~16 MiB v5e/v6e
    vmem_limit = int(vmem_cap * 3 // 4)                # 48 MiB v7x,  96 MiB v5e/v6e

    # --- gate path (tiny) ----------------------------------------------------
    # AdaptiveAvgPool2d((4,4)) as ONE matmul over N*C_in rows (good MXU
    # utilization); x_low is read once in its native dtype, f32 accumulation.
    K = C_in * 16
    Kp = jnp.asarray(np.kron(_adaptive_pool_matrix(H, 4),
                             _adaptive_pool_matrix(W, 4)).T)          # (H*W, 16)
    pooled_flat = jnp.dot(x_low.reshape(N * C_in, H * W),
                          Kp.astype(x_low.dtype),
                          preferred_element_type=jnp.float32).reshape(N, K)

    # NOTE: weight reshapes are cheap; hoist once per weight update in training.
    w1_mat = w1.reshape(C_out, K).T.astype(jnp.float32)               # (K, C_out)
    w2_mat = w2[:, :, 0, 0].T.astype(jnp.float32)                     # (C_out, C_out)

    gate = pl.pallas_call(
        sle_gate_kernel,
        out_shape=jax.ShapeDtypeStruct((N, C_out), x_high.dtype),
        grid_spec=pltpu.PrefetchScalarGridSpec(
            num_scalar_prefetch=0,
            grid=(1,),
            in_specs=[
                pl.BlockSpec((N, K), lambda i: (0, 0)),
                pl.BlockSpec((K, C_out), lambda i: (0, 0)),
                pl.BlockSpec((C_out, C_out), lambda i: (0, 0)),
            ],
            out_specs=pl.BlockSpec((N, C_out), lambda i: (0, 0)),
        ),
        compiler_params=pltpu.CompilerParams(
            dimension_semantics=("arbitrary",)),
    )(pooled_flat, w1_mat, w2_mat)

    # --- scale path (dominant, memory-bound) ----------------------------------
    plan = _choose_scale_tiling(N, C_out, Hh, Wh, itemsize, target_block_bytes)
    cost = pl.CostEstimate(
        flops=int(N * C_out * HW),
        transcendentals=0,
        bytes_accessed=int((2 * N * C_out * HW + N * C_out) * itemsize))
    # TODO(synk): optionally sweep pipeline_mode=pl.Buffered(3) on the x_high
    # BlockSpec when the chosen block is small; depth-2 suffices at multi-MiB.

    if plan["mode"] == "flat":
        # Lane-dense: Hh*Wh flattened onto lanes (free reshape, no transpose).
        nb, t = plan["nb"], plan["t"]
        grid = (N // nb, HW // t)
        out_flat = pl.pallas_call(
            sle_scale_kernel,
            out_shape=jax.ShapeDtypeStruct((N, C_out, HW), x_high.dtype),
            grid_spec=pltpu.PrefetchScalarGridSpec(
                num_scalar_prefetch=0,
                grid=grid,
                in_specs=[
                    pl.BlockSpec((nb, C_out, 1), lambda n, s: (n, 0, 0)),
                    pl.BlockSpec((nb, C_out, t), lambda n, s: (n, 0, s)),
                ],
                out_specs=pl.BlockSpec((nb, C_out, t), lambda n, s: (n, 0, s)),
            ),
            compiler_params=pltpu.CompilerParams(
                dimension_semantics=("parallel",) * len(grid),
                vmem_limit_bytes=vmem_limit),
            cost_estimate=cost,
        )(gate.reshape(N, C_out, 1), x_high.reshape(N, C_out, HW))
        return out_flat.reshape(N, C_out, Hh, Wh)

    # 4-D fallback (Hh*Wh not a multiple of 128): tile rows of Hh / channels.
    nb, cb, th = plan["nb"], plan["cb"], plan["th"]
    grid = (N // nb, C_out // cb, Hh // th)
    return pl.pallas_call(
        sle_scale_kernel,
        out_shape=jax.ShapeDtypeStruct((N, C_out, Hh, Wh), x_high.dtype),
        grid_spec=pltpu.PrefetchScalarGridSpec(
            num_scalar_prefetch=0,
            grid=grid,
            in_specs=[
                pl.BlockSpec((nb, cb, 1, 1), lambda n, c, r: (n, c, 0, 0)),
                pl.BlockSpec((nb, cb, th, Wh), lambda n, c, r: (n, c, r, 0)),
            ],
            out_specs=pl.BlockSpec((nb, cb, th, Wh), lambda n, c, r: (n, c, r, 0)),
        ),
        compiler_params=pltpu.CompilerParams(
            dimension_semantics=("parallel",) * len(grid),
            vmem_limit_bytes=vmem_limit),
        cost_estimate=cost,
    )(gate.reshape(N, C_out, 1, 1), x_high)


# --------------------------------------------------------------------------- #
# Pure-JAX reference matching the PyTorch module
# --------------------------------------------------------------------------- #
def sle_block_ref(x_low, x_high, w1, w2):
    P_h = jnp.asarray(_adaptive_pool_matrix(x_low.shape[2], 4))
    P_w = jnp.asarray(_adaptive_pool_matrix(x_low.shape[3], 4))
    pooled = jnp.einsum('ncpq,ip,jq->ncij', x_low, P_h, P_w)   # AdaptiveAvgPool2d
    h1 = jnp.einsum('ncij,ocij->no', pooled, w1)               # Conv2d 4x4, no bias
    h1 = h1 * jax.nn.sigmoid(h1)                               # Swish
    h2 = jnp.einsum('nc,oc->no', h1, w2[:, :, 0, 0])           # Conv2d 1x1, no bias
    gate = jax.nn.sigmoid(h2)                                  # Sigmoid
    return gate[:, :, None, None] * x_high


if __name__ == "__main__":
    key = jax.random.PRNGKey(0)

    configs = [
        # (N, C_in, C_out, H,  W,  Hh, Wh)
        (2, 4, 8, 16, 16, 32, 32),   # Hh*Wh % 128 == 0  -> lane-dense flat path
        (2, 4, 8, 10, 10, 24, 24),   # Hh*Wh % 128 != 0  -> 4-D fallback path
    ]

    for (N, C_in, C_out, H, W, Hh, Wh) in configs:
        k1, k2, k3, k4, key = jax.random.split(key, 5)
        x_low = jax.random.normal(k1, (N, C_in, H, W), dtype=jnp.float32)
        x_high = jax.random.normal(k2, (N, C_out, Hh, Wh), dtype=jnp.float32)
        w1 = jax.random.normal(k3, (C_out, C_in, 4, 4), dtype=jnp.float32) * 0.1
        w2 = jax.random.normal(k4, (C_out, C_out, 1, 1), dtype=jnp.float32) * 0.3

        out = jax.block_until_ready(sle_block_forward(x_low, x_high, w1, w2))
        ref = sle_block_ref(x_low, x_high, w1, w2)

        assert out.shape == x_high.shape
        np.testing.assert_allclose(np.asarray(out), np.asarray(ref),
                                   rtol=1e-5, atol=1e-5)

    print("KERNEL_OK")
</pallas_src>

<mosaic_0001>
module attributes {stable_mosaic.version = 11 : i64} {
  func.func @sle_gate_kernel(%arg0: i32, %arg1: memref<2x64xf32, #tpu.memory_space<vmem>>, %arg2: memref<64x8xf32, #tpu.memory_space<vmem>>, %arg3: memref<8x8xf32, #tpu.memory_space<vmem>>, %arg4: memref<2x8xf32, #tpu.memory_space<vmem>>) attributes {dimension_semantics = [#tpu.dimension_semantics<arbitrary>], iteration_bounds = array<i64: 1>, scalar_prefetch = 0 : i64, scratch_operands = 0 : i64, tpu.core_type = #tpu.core_type<tc>, window_params = [{pipeline_mode = #tpu.pipeline_mode<synchronous>, transform_indices = @transform_0, window_bounds = array<i64: 2, 64>}, {pipeline_mode = #tpu.pipeline_mode<synchronous>, transform_indices = @transform_1, window_bounds = array<i64: 64, 8>}, {pipeline_mode = #tpu.pipeline_mode<synchronous>, transform_indices = @transform_2, window_bounds = array<i64: 8, 8>}, {pipeline_mode = #tpu.pipeline_mode<synchronous>, transform_indices = @transform_3, window_bounds = array<i64: 2, 8>}]} {
    %c0 = arith.constant 0 : index
    %c0_0 = arith.constant 0 : index
    %0 = vector.load %arg1[%c0, %c0_0] : memref<2x64xf32, #tpu.memory_space<vmem>>, vector<2x64xf32>
    %c0_1 = arith.constant 0 : index
    %c0_2 = arith.constant 0 : index
    %1 = vector.load %arg2[%c0_1, %c0_2] : memref<64x8xf32, #tpu.memory_space<vmem>>, vector<64x8xf32>
    %cst = arith.constant dense<0.000000e+00> : vector<2x8xf32>
    %2 = tpu.matmul %0, %1, %cst {dimension_numbers = #tpu.dot_dimension_numbers<[1], [0], [0], [1], [0, 0, 1, 1], [], []>} : vector<2x64xf32>, vector<64x8xf32>, vector<2x8xf32> -> vector<2x8xf32>
    %3 = arith.negf %2 : vector<2x8xf32>
    %4 = math.exp %3 : vector<2x8xf32>
    %cst_3 = arith.constant 1.000000e+00 : f32
    %5 = vector.broadcast %cst_3 : f32 to vector<2x8xf32>
    %6 = arith.addf %5, %4 : vector<2x8xf32>
    %7 = arith.divf %5, %6 : vector<2x8xf32>
    %8 = arith.mulf %2, %7 : vector<2x8xf32>
    %c0_4 = arith.constant 0 : index
    %c0_5 = arith.constant 0 : index
    %9 = vector.load %arg3[%c0_4, %c0_5] : memref<8x8xf32, #tpu.memory_space<vmem>>, vector<8x8xf32>
    %cst_6 = arith.constant dense<0.000000e+00> : vector<2x8xf32>
    %10 = tpu.matmul %8, %9, %cst_6 {dimension_numbers = #tpu.dot_dimension_numbers<[1], [0], [0], [1], [0, 0, 1, 1], [], []>} : vector<2x8xf32>, vector<8x8xf32>, vector<2x8xf32> -> vector<2x8xf32>
    %11 = arith.negf %10 : vector<2x8xf32>
    %12 = math.exp %11 : vector<2x8xf32>
    %cst_7 = arith.constant 1.000000e+00 : f32
    %13 = vector.broadcast %cst_7 : f32 to vector<2x8xf32>
    %14 = arith.addf %13, %12 : vector<2x8xf32>
    %15 = arith.divf %13, %14 : vector<2x8xf32>
    %c0_8 = arith.constant 0 : index
    %c0_9 = arith.constant 0 : index
    %16 = vector.load %arg4[%c0_8, %c0_9] : memref<2x8xf32, #tpu.memory_space<vmem>>, vector<2x8xf32>
    tpu.vector_store %arg4[%c0_8, %c0_9], %15 {strides = array<i32>} : memref<2x8xf32, #tpu.memory_space<vmem>>, vector<2x8xf32>,
    return
  }
  func.func @transform_0(%arg0: i32) -> (i32, i32) {
    %c0_i32 = arith.constant 0 : i32
    %c0_i32_0 = arith.constant 0 : i32
    %c0_i32_1 = arith.constant 0 : i32
    return %c0_i32, %c0_i32_0 : i32, i32
  }
  func.func @transform_1(%arg0: i32) -> (i32, i32) {
    %c0_i32 = arith.constant 0 : i32
    %c0_i32_0 = arith.constant 0 : i32
    %c0_i32_1 = arith.constant 0 : i32
    return %c0_i32, %c0_i32_0 : i32, i32
  }
  func.func @transform_2(%arg0: i32) -> (i32, i32) {
    %c0_i32 = arith.constant 0 : i32
    %c0_i32_0 = arith.constant 0 : i32
    %c0_i32_1 = arith.constant 0 : i32
    return %c0_i32, %c0_i32_0 : i32, i32
  }
  func.func @transform_3(%arg0: i32) -> (i32, i32) {
    %c0_i32 = arith.constant 0 : i32
    %c0_i32_0 = arith.constant 0 : i32
    %c0_i32_1 = arith.constant 0 : i32
    return %c0_i32, %c0_i32_0 : i32, i32
  }
}

</mosaic_0001>

<bundles_post_ra>
// kernel: tpu_custom_call.1
= control target key start
LH: loop header
LB: loop body
LE: loop exit
PB: predicated region body
PF: predicated region fallthrough
CT: control target
= control target key end

     0   :  { %s223_s0 = inlined_call_operand.vmem [shape: f32[2,64], index: 0, kind: input, shape index: {}]   ;;  %s224_s1 = inlined_call_operand.vmem [shape: f32[64,8], index: 1, kind: input, shape index: {}]   ;;  %s225_s2 = inlined_call_operand.vmem [shape: f32[8,8], index: 2, kind: input, shape index: {}]   ;;  %s226_s3 = inlined_call_operand.hbm [shape: f32[2,8], index: 3, kind: output, shape index: {}]  }
   0x1   :  { %v23_v0 = vld [vmem:[%s224_s1 + $0x38] sm:$0xff]  ;;  %v22_v1 = vld [vmem:[%s224_s1 + $0x30] sm:$0xff]  ;;  %v21_v2 = vld [vmem:[%s224_s1 + $0x28] sm:$0xff] }
   0x2   :  { %36 = vmatpush.msra.mxu0 %v23_v0 }
   0x4   :  { %37 = vmatpush.msra.mxu0 %v22_v1 }
   0x5   :  { %8 = vsyncpa [#allocation3], 0  ;;  %v20_v3 = vld [vmem:[%s224_s1 + $0x20] sm:$0xff]  ;;  %v19_v4 = vld [vmem:[%s224_s1 + $0x18] sm:$0xff]  ;;  %vm24_vm0 = vcmask 523264   ;;  %vm69_vm5 = vcmask 64512  }
   0x6   :  { %38 = vmatpush.msra.mxu0 %v21_v2  ;;  %v18_v5 = vld [vmem:[%s224_s1 + $0x10] sm:$0xff]  ;;  %v17_v6 = vld [vmem:[%s224_s1 + $0x8] sm:$0xff]  ;;  %v16_v7 = vld [vmem:[%s224_s1] sm:$0xff]  ;;  %s121_s6 = sshll.u32 %s226_s3, 4  ;;  %vm112_vm9 = vcmask 58368   ;;  %s122_s6 = int_to_ptr.hbm [resolvable:$true] %s121_s6 }
   0x7   :  { %v15_v8 = vld [vmem:[%s223_s0] sm:$0x3]  ;;  %s169_s0 = smov [#allocation2]  }
   0x8   :  { %39 = vmatpush.msra.mxu0 %v20_v3  ;;  %v68_v9 = vld [vmem:[%s225_s2] sm:$0xff]  ;;  %s119_s1 = sshll.u32 %s169_s0, 4  ;;  %s120_s1 = int_to_ptr.vmem [resolvable:$true] %s119_s1 }
   0x9   :  { %88 = vmatpush.msra.mxu1 %v68_v9 }
   0xa   :  { %40 = vmatpush.msra.mxu0 %v19_v4 }
   0xc   :  { %41 = vmatpush.msra.mxu0 %v18_v5 }
   0xe   :  { %42 = vmatpush.msra.mxu0 %v17_v6 }
  0x10   :  { %43 = vmatpush.msra.mxu0 %v16_v7 }
  0x11   :  { %130 = vmatmul.msk.f32.vlgmr.msra.gmra.mxu0 %vm24_vm0, %v15_v8 }
  0x8e   :  { %v45_v10 = vpop.f32.mrf.mxu0 }
  0x8f   :  { %v131_v11 = vmul.f32 -1.442695, %v45_v10 }
  0x91   :  { %135 = vpow2.f32 %v131_v11 }
  0x97   :  { %v136_v12 = vpop.eup %135 }
  0x98   :  { %v51_v13 = vadd.f32 1.0, %v136_v12 }
  0x9a   :  { %137 = vrcp.f32 %v51_v13  ;;  %v63_v17 = vand.u32 2147483648, %v51_v13  ;;  %v61_v19 = vand.u32 2147483647, %v51_v13  ;;  %vm57_vm2 = vweird.f32 %v51_v13 }
  0x9c   :  { %v64_v21 = vor.u32 1.1754944e-38, %v63_v17  ;;  %vm62_vm4 = vcmp.eq.f32.partialorder %v61_v19, 8.507059e+37 }
  0xa0   :  { %v138_v14 = vpop.eup %137 }
  0xa1   :  { %v53_v15 = vmul.f32 %v138_v14, %v51_v13  ;;  %vm58_vm1 = vweird.f32 %v138_v14 }
  0xa2   :  { %vm59_vm3 = vmor %vm57_vm2, %vm58_vm1 }
  0xa3   :  { %v54_v16 = vsub.f32 1.0, %v53_v15 }
  0xa5   :  { %v55_v18 = vmul.f32 %v138_v14, %v54_v16 }
  0xa7   :  { %v56_v20 = vadd.f32 %v138_v14, %v55_v18 }
  0xa9   :  { %v60_v22 = vsel %vm59_vm3, %v138_v14, %v56_v20 }
  0xaa   :  { %v65_v23 = vsel %vm62_vm4, %v64_v21, %v60_v22 }
  0xab   :  { %v67_v24 = vmul.f32 %v65_v23, %v45_v10 }
  0xad   :  { %132 = vmatmul.msk.f32.vlgmr.msra.gmra.mxu1 %vm69_vm5, %v67_v24 }
 0x12a   :  { %v90_v25 = vpop.f32.mrf.mxu1 }
 0x12b   :  { %v133_v26 = vmul.f32 -1.442695, %v90_v25 }
 0x12d   :  { %139 = vpow2.f32 %v133_v26 }
 0x133   :  { %v140_v27 = vpop.eup %139 }
 0x134   :  { %v96_v28 = vadd.f32 1.0, %v140_v27 }
 0x136   :  { %141 = vrcp.f32 %v96_v28  ;;  %v108_v32 = vand.u32 2147483648, %v96_v28  ;;  %v106_v34 = vand.u32 2147483647, %v96_v28  ;;  %vm102_vm7 = vweird.f32 %v96_v28 }
 0x138   :  { %v109_v36 = vor.u32 1.1754944e-38, %v108_v32  ;;  %vm107_vm10 = vcmp.eq.f32.partialorder %v106_v34, 8.507059e+37 }
 0x13c   :  { %v142_v29 = vpop.eup %141 }
 0x13d   :  { %v98_v30 = vmul.f32 %v142_v29, %v96_v28  ;;  %vm103_vm6 = vweird.f32 %v142_v29 }
 0x13e   :  { %vm104_vm8 = vmor %vm102_vm7, %vm103_vm6 }
 0x13f   :  { %v99_v31 = vsub.f32 1.0, %v98_v30 }
 0x141   :  { %v100_v33 = vmul.f32 %v142_v29, %v99_v31 }
 0x143   :  { %v101_v35 = vadd.f32 %v142_v29, %v100_v33 }
 0x145   :  { %v105_v37 = vsel %vm104_vm8, %v142_v29, %v101_v35 }
 0x146   :  { %v110_v38 = vsel %vm107_vm10, %v109_v36, %v105_v37 }
 0x147   :  { %113 = vst.msk [vmem:[#allocation2] sm:$0x3] %vm112_vm9, %v110_v38 }
 0x148   :  { %124 = dma.vmem_to_hbm [thread:$0]  %s120_s1, 32, %s122_s6, [#allocation3]  }
 0x149   :  { %167 = dma.done.wait [#allocation3], 32  }
 0x14a   :  { %168 = vsyncadd [#allocation3], 4294967264 }
 0x14b   :  { %129 = vsyncpa [#allocation3], 1 }

</bundles_post_ra>
